<compile_context>
chip_gen: v5e
topology: v5e:2x2
jax: 0.10.0
libtpu: 0.0.40
codegen_flags: <defaults>
</compile_context>

<pallas_src>
import jax
import jax.numpy as jnp
from jax.experimental import pallas as pl
from jax.experimental.pallas import tpu as pltpu


def mlp_kernel(x_ref, w_ref, b_ref, o_ref):
    # x_ref: (B, C_in, tn) f32, w_ref: (C_out, C_in) f32,
    # b_ref: (C_out, 1) f32,    o_ref: (B, C_out, tn) out_dtype
    c_out, tn = o_ref.shape[1], o_ref.shape[2]
    w = w_ref[...].astype(jnp.bfloat16)                       # in-kernel cast
    b_bcast = jnp.broadcast_to(b_ref[...], (c_out, tn))       # hoisted, once/step
    for bi in range(x_ref.shape[0]):
        x_b = x_ref[bi].astype(jnp.bfloat16)                  # in-kernel cast
        y = jnp.dot(w, x_b, preferred_element_type=jnp.float32) + b_bcast
        o_ref[bi] = y.astype(o_ref.dtype)


def _vmem_capacity_bytes():
    """Per-TensorCore VMEM capacity; conservative fallback if query fails."""
    try:
        info = pltpu.get_tpu_info()
        cap = getattr(info, "vmem_capacity_bytes", None)
        if cap:
            return int(cap)
    except Exception:
        pass
    return 64 << 20  # v7x-class per-TC VMEM (smallest current generation)


def _pick_tile_n(N, B, C_in, C_out, out_itemsize, vmem_cap):
    """Largest lane-dense spatial tile that keeps double-buffered tiles in VMEM."""
    small_vmem = vmem_cap < (96 << 20)          # v7x-class part (64 MiB / TC)
    vmem_budget = (24 << 20) if small_vmem else (48 << 20)
    tn_max = 2048 if small_vmem else 8192
    # Bytes per lane column: 2x-buffered f32 input tile + 2x-buffered output tile.
    per_col = 2 * B * (C_in * 4 + C_out * out_itemsize)
    fit = max(128, (vmem_budget // per_col) // 128 * 128)
    tn = min(N, tn_max, fit)
    if small_vmem and N >= 256:
        # v7x has 2 TensorCores sharing the "parallel" grid axis: force >= 2 steps.
        half = max(128, (pl.cdiv(N, 2) // 128) * 128)
        tn = min(tn, half)
    if tn >= N:
        return N  # whole-N block (full-dim block is always legal)
    tn = max(128, (tn // 128) * 128)
    # Prefer a tile that divides N evenly (no padded edge tile).
    t = tn
    while t >= 128 and N % t != 0:
        t -= 128
    return t if (t >= 128 and N % t == 0) else tn


def mlp_forward(x_nchw, weight, bias, *, out_dtype=None, tile_n=None):
    """x_nchw: (B, C_in, H, W); weight: (C_out, C_in); bias: (C_out,)
    Returns (B, C_out, H*W) -- same as the PyTorch module's output.
    out_dtype: defaults to x.dtype (f32 keeps module semantics); pass
    jnp.bfloat16 to halve output HBM writeback when the consumer tolerates it."""
    B, C_in, H, W = x_nchw.shape
    C_out = weight.shape[0]
    N = H * W
    out_dtype = x_nchw.dtype if out_dtype is None else jnp.dtype(out_dtype)
    out_itemsize = jnp.dtype(out_dtype).itemsize

    # Pure reshape (metadata only) -- no dtype cast pass over x in the wrapper.
    x_flat = x_nchw.reshape(B, C_in, N)
    w_f32 = weight.astype(jnp.float32)
    bias2d = bias.astype(jnp.float32).reshape(C_out, 1)

    vmem_cap = _vmem_capacity_bytes()
    if tile_n is not None:
        tn = N if tile_n >= N else int(tile_n)   # test/override hook
    else:
        tn = _pick_tile_n(N, B, C_in, C_out, out_itemsize, vmem_cap)
    grid_n = pl.cdiv(N, tn)

    # Scoped-VMEM limit: actual need + headroom, capped at ~80% of physical VMEM
    # (and never above 100 MiB on 128 MiB parts).
    needed = (2 * B * tn * (C_in * 4 + C_out * out_itemsize)
              + 2 * C_out * C_in * 4 + 2 * C_out * 4)
    cap_limit = min(int(0.80 * vmem_cap), 100 << 20)
    vmem_limit = int(min(max(needed + (4 << 20), 16 << 20), cap_limit))

    out = pl.pallas_call(
        mlp_kernel,
        out_shape=jax.ShapeDtypeStruct((B, C_out, N), out_dtype),
        grid_spec=pltpu.PrefetchScalarGridSpec(
            num_scalar_prefetch=0,
            grid=(grid_n,),
            in_specs=[
                pl.BlockSpec((B, C_in, tn), lambda n: (0, 0, n)),
                pl.BlockSpec((C_out, C_in), lambda n: (0, 0)),   # resident
                pl.BlockSpec((C_out, 1), lambda n: (0, 0)),      # resident
            ],
            out_specs=pl.BlockSpec((B, C_out, tn), lambda n: (0, 0, n)),
        ),
        compiler_params=pltpu.CompilerParams(
            dimension_semantics=("parallel",),
            vmem_limit_bytes=vmem_limit,
        ),
    )(x_flat, w_f32, bias2d)
    return out


if __name__ == "__main__":
    # Small shapes consistent with the module: B=2, input_dim=32, output_dim=32,
    # spatial 16x16 -> N=256.
    B, C_in, C_out, H, W = 2, 32, 32, 16, 16

    key = jax.random.PRNGKey(0)
    kx, kw, kb = jax.random.split(key, 3)

    x = jax.random.normal(kx, (B, C_in, H, W), dtype=jnp.float32)
    # nn.Linear parameters: weight (out, in), bias (out,)
    weight = jax.random.normal(kw, (C_out, C_in), dtype=jnp.float32) * 0.05
    bias = jax.random.normal(kb, (C_out,), dtype=jnp.float32) * 0.05

    def ref_fn(xa, wa, ba):
        # Mirrors the PyTorch forward and the kernel's numerics
        # (bf16 inputs/weights, f32 accumulation, f32 bias add).
        b_, c_, h_, w_ = xa.shape
        xb = xa.astype(jnp.bfloat16).astype(jnp.float32)
        wb = wa.astype(jnp.bfloat16).astype(jnp.float32)
        x_t = xb.reshape(b_, c_, h_ * w_).transpose(0, 2, 1)   # (B, N, C_in)
        return (x_t @ wb.T + ba).transpose(0, 2, 1)            # (B, C_out, N)

    out = jax.block_until_ready(mlp_forward(x, weight, bias))
    ref = ref_fn(x, weight, bias)
    assert out.shape == (B, C_out, H * W)
    assert out.dtype == x.dtype
    assert jnp.allclose(out, ref, atol=1e-3, rtol=1e-3)

    # Edge-tile check: N = 225 not divisible by the forced 128-wide tile, so the
    # last block is partially out-of-bounds (Pallas masks the padded lanes).
    H2, W2 = 15, 15
    x2 = jax.random.normal(kx, (B, C_in, H2, W2), dtype=jnp.float32)
    out2 = jax.block_until_ready(mlp_forward(x2, weight, bias, tile_n=128))
    ref2 = ref_fn(x2, weight, bias)
    assert out2.shape == (B, C_out, H2 * W2)
    assert jnp.allclose(out2, ref2, atol=1e-3, rtol=1e-3)

    print("KERNEL_OK")
</pallas_src>

<mosaic_0001>
module attributes {stable_mosaic.version = 11 : i64} {
  func.func @mlp_kernel(%arg0: i32, %arg1: memref<2x32x128xf32, #tpu.memory_space<vmem>>, %arg2: memref<32x32xf32, #tpu.memory_space<vmem>>, %arg3: memref<32x1xf32, #tpu.memory_space<vmem>>, %arg4: memref<2x32x128xf32, #tpu.memory_space<vmem>>) attributes {dimension_semantics = [#tpu.dimension_semantics<parallel>], iteration_bounds = array<i64: 2>, scalar_prefetch = 0 : i64, scratch_operands = 0 : i64, tpu.core_type = #tpu.core_type<tc>, window_params = [{transform_indices = @transform_0, window_bounds = array<i64: 2, 32, 128>}, {pipeline_mode = #tpu.pipeline_mode<synchronous>, transform_indices = @transform_1, window_bounds = array<i64: 32, 32>}, {pipeline_mode = #tpu.pipeline_mode<synchronous>, transform_indices = @transform_2, window_bounds = array<i64: 32, 1>}, {transform_indices = @transform_3, window_bounds = array<i64: 2, 32, 128>}]} {
    %c0 = arith.constant 0 : index
    %c0_0 = arith.constant 0 : index
    %0 = vector.load %arg2[%c0, %c0_0] : memref<32x32xf32, #tpu.memory_space<vmem>>, vector<32x32xf32>
    %1 = arith.truncf %0 : vector<32x32xf32> to vector<32x32xbf16>
    %c0_1 = arith.constant 0 : index
    %c0_2 = arith.constant 0 : index
    %2 = vector.load %arg3[%c0_1, %c0_2] : memref<32x1xf32, #tpu.memory_space<vmem>>, vector<32x1xf32>
    %3 = vector.shape_cast %2 : vector<32x1xf32> to vector<32x1xf32>
    %4 = vector.broadcast %3 : vector<32x1xf32> to vector<32x128xf32>
    %c0_3 = arith.constant 0 : index
    %c0_4 = arith.constant 0 : index
    %c0_5 = arith.constant 0 : index
    %5 = vector.load %arg1[%c0_3, %c0_4, %c0_5] : memref<2x32x128xf32, #tpu.memory_space<vmem>>, vector<1x32x128xf32>
    %6 = vector.shape_cast %5 : vector<1x32x128xf32> to vector<32x128xf32>
    %7 = arith.truncf %6 : vector<32x128xf32> to vector<32x128xbf16>
    %cst = arith.constant dense<0.000000e+00> : vector<32x128xf32>
    %8 = tpu.matmul %1, %7, %cst {dimension_numbers = #tpu.dot_dimension_numbers<[1], [0], [0], [1], [0, 0, 1, 1], [], []>} : vector<32x32xbf16>, vector<32x128xbf16>, vector<32x128xf32> -> vector<32x128xf32>
    %9 = arith.addf %8, %4 : vector<32x128xf32>
    %c0_6 = arith.constant 0 : index
    %c0_7 = arith.constant 0 : index
    %c0_8 = arith.constant 0 : index
    %10 = vector.load %arg4[%c0_6, %c0_7, %c0_8] : memref<2x32x128xf32, #tpu.memory_space<vmem>>, vector<1x32x128xf32>
    %11 = vector.shape_cast %10 : vector<1x32x128xf32> to vector<32x128xf32>
    %12 = vector.shape_cast %9 : vector<32x128xf32> to vector<1x32x128xf32>
    tpu.vector_store %arg4[%c0_6, %c0_7, %c0_8], %12 {strides = array<i32>} : memref<2x32x128xf32, #tpu.memory_space<vmem>>, vector<1x32x128xf32>,
    %c1 = arith.constant 1 : index
    %c0_9 = arith.constant 0 : index
    %c0_10 = arith.constant 0 : index
    %13 = vector.load %arg1[%c1, %c0_9, %c0_10] : memref<2x32x128xf32, #tpu.memory_space<vmem>>, vector<1x32x128xf32>
    %14 = vector.shape_cast %13 : vector<1x32x128xf32> to vector<32x128xf32>
    %15 = arith.truncf %14 : vector<32x128xf32> to vector<32x128xbf16>
    %cst_11 = arith.constant dense<0.000000e+00> : vector<32x128xf32>
    %16 = tpu.matmul %1, %15, %cst_11 {dimension_numbers = #tpu.dot_dimension_numbers<[1], [0], [0], [1], [0, 0, 1, 1], [], []>} : vector<32x32xbf16>, vector<32x128xbf16>, vector<32x128xf32> -> vector<32x128xf32>
    %17 = arith.addf %16, %4 : vector<32x128xf32>
    %c1_12 = arith.constant 1 : index
    %c0_13 = arith.constant 0 : index
    %c0_14 = arith.constant 0 : index
    %18 = vector.load %arg4[%c1_12, %c0_13, %c0_14] : memref<2x32x128xf32, #tpu.memory_space<vmem>>, vector<1x32x128xf32>
    %19 = vector.shape_cast %18 : vector<1x32x128xf32> to vector<32x128xf32>
    %20 = vector.shape_cast %17 : vector<32x128xf32> to vector<1x32x128xf32>
    tpu.vector_store %arg4[%c1_12, %c0_13, %c0_14], %20 {strides = array<i32>} : memref<2x32x128xf32, #tpu.memory_space<vmem>>, vector<1x32x128xf32>,
    return
  }
  func.func @transform_0(%arg0: i32) -> (i32, i32, i32) {
    %c0_i32 = arith.constant 0 : i32
    %c0_i32_0 = arith.constant 0 : i32
    %c0_i32_1 = arith.constant 0 : i32
    return %c0_i32, %c0_i32_0, %arg0 : i32, i32, i32
  }
  func.func @transform_1(%arg0: i32) -> (i32, i32) {
    %c0_i32 = arith.constant 0 : i32
    %c0_i32_0 = arith.constant 0 : i32
    %c0_i32_1 = arith.constant 0 : i32
    return %c0_i32, %c0_i32_0 : i32, i32
  }
  func.func @transform_2(%arg0: i32) -> (i32, i32) {
    %c0_i32 = arith.constant 0 : i32
    %c0_i32_0 = arith.constant 0 : i32
    %c0_i32_1 = arith.constant 0 : i32
    return %c0_i32, %c0_i32_0 : i32, i32
  }
  func.func @transform_3(%arg0: i32) -> (i32, i32, i32) {
    %c0_i32 = arith.constant 0 : i32
    %c0_i32_0 = arith.constant 0 : i32
    %c0_i32_1 = arith.constant 0 : i32
    return %c0_i32, %c0_i32_0, %arg0 : i32, i32, i32
  }
}

</mosaic_0001>

<bundles_post_ra>
// kernel: tpu_custom_call.1
= control target key start
LH: loop header
LB: loop body
LE: loop exit
PB: predicated region body
PF: predicated region fallthrough
CT: control target
= control target key end

     0   :  { %8 = vsyncpa [#allocation3], 0  ;;  %s740_s0 = inlined_call_operand.hbm [shape: f32[2,32,256], index: 0, kind: input, shape index: {}]   ;;  %s741_s1 = inlined_call_operand.vmem [shape: f32[32,32], index: 1, kind: input, shape index: {}]   ;;  %s742_s2 = inlined_call_operand.vmem [shape: f32[32,1], index: 2, kind: input, shape index: {}]   ;;  %s743_s3 = inlined_call_operand.hbm [shape: f32[2,32,256], index: 3, kind: output, shape index: {}]  }
   0x1   :  { %10 = vsyncpa [#allocation3 + $0x1], 0 }
   0x2   :  { %11 = vsyncpa [#allocation4], 0 }
   0x3   :  { %13 = vsyncpa [#allocation4 + $0x1], 0  ;;  %s584_s12 = smov 0   ;;  %s586_s13 = smov 0  }
   0x4   :  { %s588_s14 = smov 0   ;;  %s590_s15 = smov 0  }
   0x5 LB: > { %s605_s16 = sadd.s32 4294967295, %s555_s15   ;;  %s376_s17 = sadd.s32 4294967294, %s555_s15   ;;  %s555_s15 = sphi %s590_s15, %s752_s15   ;;  %s551_s14 = sphi %s588_s14, %s751_s14   ;;  %s547_s13 = sphi %s586_s13, %s750_s13   ;;  %s543_s12 = sphi %s584_s12, %s749_s12  }
   0x6   : > { %s609_s18 = sadd.s32 1, %s555_s15   ;;  %s26_s19 = sadd.s32 1, %s551_s14 }
   0x7   : > { %s23_s20 = ssub.s32 %s555_s15, %s609_s18  ;;  %p33_p0 = scmp.ne.s32.totalorder %s551_s14, %s547_s13 }
   0x8   : > { %p24_p1 = scmp.eq.s32.totalorder %s23_s20, 0  ;;  %p34_p2 = scmp.eq.s32.totalorder %s555_s15, 0 }
   0x9   : > { %p39_p3 = scmp.ne.s32.totalorder %s547_s13, %s543_s12  ;;  %p40_p4 = scmp.eq.s32.totalorder %s605_s16, 0 }
   0xa   : > { %s621_s21 = scalar_select %p24_p1, %s551_s14, %s26_s19  }
   0xb   : > { %p623_p5 = por %p34_p2, %p33_p0  ;;  %p627_p6 = por %p40_p4, %p39_p3 }
   0xc   : > { %p105_p7 = scmp.eq.s32.totalorder %s605_s16, 1  ;;  %p111_p8 = scmp.eq.s32.totalorder %s376_s17, 1 }
   0xd   : > { %p378_p9 = scmp.ge.s32.totalorder %s555_s15, 2  ;;  %p416_p10 = scmp.lt.s32.totalorder %s555_s15, 2 }
   0xe   : > { %p634_p11 = por %p105_p7, %p33_p0  ;;  %p638_p12 = por %p111_p8, %p39_p3 }
   0xf   : > { %s137_s26 = sand.u32 1, %s551_s14   ;;  %s380_s27 = sshll.u32 %s555_s15, 3 }
  0x10   : > { %s379_s28 = sshll.u32 %s137_s26, 6  ;;  %s145_s4 = scalar_lea.hbm %s740_s0, %s380_s27 }
  0x11   : > { %s146_s5 = sshll.u32 %s145_s4, 4  ;;  %s141_s6 = scalar_lea.vmem [#allocation2], %s379_s28  ;;  %s147_s5 = int_to_ptr.hbm [resolvable:$true] %s146_s5 }
  0x12   : > { %s148_s7 = sshll.u32 %s141_s6, 4  ;;  %p649_p13 = pnand %p416_p10, %p623_p5  ;;  %s149_s7 = int_to_ptr.vmem [resolvable:$true] %s148_s7 }
  0x13   : > { %p381_p0 = scmp.ge.s32.totalorder %s555_s15, 1  ;;  %s138_s9 = scalar_lea.sflag [#allocation3], %s137_s26 }
  0x14   : > { %s459_s10 = sshra.s32 %s147_s5, 4  ;;  %p463_p2 = pneg %p649_p13  ;;  %s460_s10 = int_to_ptr.hbm [resolvable:$true] %s459_s10 }
  0x15   : > { %s461_s11 = scalar_lea.hbm %s460_s10, 64  ;;  %s466_s20 = scalar_lea.hbm %s740_s0, 128 }
  0x16   : > { %p462_p1 = scmp.ne.s32.totalorder %s460_s10, %s461_s11  ;;  %p467_p5 = scmp.lt.s32.totalorder %s460_s10, %s740_s0 }
  0x17   : > { %p468_p7 = scmp.lt.s32.totalorder %s466_s20, %s461_s11 }
  0x18   : > { %p464_p3 = pnand %p463_p2, %p462_p1 }
  0x19   : > { %p469_p8 = por %p468_p7, %p467_p5 }
  0x1a   : > { %p465_p4 = pneg %p464_p3 }
  0x1c   : > { %p470_p10 = pnand %p469_p8, %p465_p4 }
  0x1e   : > { %473 = shalt.err (!%p470_p10)
}
  0x1f   : > { %s557_s26 = smov 256   ;;  %s558_s28 = smov 128  }
  0x20   : > { %s559_s29 = smov 8   ;;  %p156_p1 = scmp.lt.s32.totalorder %s555_s15, 3 }
  0x21   : > { %411 = dma.hbm_to_vmem [thread:$0]  (!%p649_p13), %s147_s5, 1024, %s149_s7, %s138_s9, %s557_s26, %s558_s28, %s559_s29  }
  0x22   : > { %p157_p2 = pnand %p381_p0, %p156_p1 }
  0x23   : > { %s668_s30 = sand.u32 (!%p157_p2), 1, %s547_s13  }
  0x24   : > { %160 = sbr.rel (%p157_p2) target bundleno = 200 (0xc8), region = 32  ;;  %s382_s4 = sshll.u32 (!%p157_p2), %s668_s30, 6 }
  0x25   : > { %s163_s6 = scalar_lea.sflag (!%p157_p2), [#allocation3], %s668_s30  ;;  %s166_s10 = scalar_lea.vmem (!%p157_p2), [#allocation2], %s382_s4 }
  0x29   : > { %534 = dma.done.wait (%p627_p6), %s163_s6, 1024  }
  0x2a   : > { %536 = vsyncadd (%p627_p6), %s163_s6, 4294966272  ;;  %v560_v0 = vmov 0   ;;  %v223_v1 = vld [vmem:[%s166_s10 + $0x10] sm:$0xff]  ;;  %v224_v2 = vld [vmem:[%s166_s10 + $0x18] sm:$0xff]  ;;  %vm227_vm0 = vcmask 261120   ;;  %s189_s5 = scalar_lea.vmem [#allocation5], %s382_s4 }
  0x2b   : > { %458 = vset.pattern.permute.xlu1 %v560_v0  ;;  %457 = vset.pattern.permute.xlu0 %v560_v0  ;;  %v388_v3 = vld [vmem:[%s166_s10 + $0x30] sm:$0xff]  ;;  %v226_v4 = vpack.c.bf16 %v224_v2, %v223_v1  ;;  %v389_v5 = vld [vmem:[%s166_s10 + $0x38] sm:$0xff]  ;;  %v221_v6 = vld [vmem:[%s166_s10] sm:$0xff]  ;;  %s397_s7 = sshll.u32 %s605_s16, 3  ;;  %s300_s4 = sshll.u32 %s189_s5, 4  ;;  %s708_s4 = int_to_ptr.vmem [resolvable:$true] %s300_s4 }
  0x2c   : > { %v222_v7 = vld [vmem:[%s166_s10 + $0x8] sm:$0xff]  ;;  %v263_v8 = vpack.c.bf16 %v389_v5, %v388_v3  ;;  %v386_v9 = vld [vmem:[%s166_s10 + $0x20] sm:$0xff]  ;;  %v193_v14 = vld [vmem:[%s741_s1 + $0x10] sm:$0xff]  ;;  %s299_s9 = scalar_lea.hbm %s743_s3, %s397_s7  ;;  %s289_s11 = scalar_lea.sflag [#allocation4], %s668_s30 }
  0x2d   : > { %v387_v10 = vld [vmem:[%s166_s10 + $0x28] sm:$0xff]  ;;  %v191_v11 = vld [vmem:[%s741_s1] sm:$0xff]  ;;  %240 = vmatpush.bf16.msra.mxu0 %v226_v4  ;;  %400 = vmatpush.bf16.msra.mxu2 %v226_v4  ;;  %v225_v12 = vpack.c.bf16 %v222_v7, %v221_v6  ;;  %v194_v15 = vld [vmem:[%s741_s1 + $0x18] sm:$0xff]  ;;  %s302_s16 = sshll.u32 %s299_s9, 4  ;;  %s509_s27 = scalar_lea.hbm %s743_s3, 128  ;;  %s303_s16 = int_to_ptr.hbm [resolvable:$true] %s302_s16 }
  0x2e   : > { %v192_v13 = vld [vmem:[%s741_s1 + $0x8] sm:$0xff]  ;;  %270 = vmatpush.bf16.msra.mxu1 %v263_v8  ;;  %402 = vmatpush.bf16.msra.mxu3 %v263_v8  ;;  %v262_v16 = vpack.c.bf16 %v387_v10, %v386_v9  ;;  %v199_v17 = vld [vmem:[%s742_s2 + $0x10] sm:$0xff]  ;;  %v197_v18 = vld [vmem:[%s742_s2] sm:$0xff]  ;;  %v196_v20 = vpack.c.bf16 %v194_v15, %v193_v14  ;;  %s503_s17 = sshra.s32 %s303_s16, 4  ;;  %s504_s17 = int_to_ptr.hbm [resolvable:$true] %s503_s17 }
  0x2f   : > { %213 = vperm.xlu1 %458, %v199_v17   ;;  %203 = vperm.xlu0 %457, %v197_v18   ;;  %v195_v19 = vpack.c.bf16 %v192_v13, %v191_v11  ;;  %v200_v21 = vld [vmem:[%s742_s2 + $0x18] sm:$0xff]  ;;  %v198_v22 = vld [vmem:[%s742_s2 + $0x8] sm:$0xff]  ;;  %s505_s19 = scalar_lea.hbm %s504_s17, 64  ;;  %p510_p3 = scmp.lt.s32.totalorder %s504_s17, %s743_s3 }
  0x30   : > { %p506_p6 = scmp.ne.s32.totalorder %s504_s17, %s505_s19  ;;  %p511_p4 = scmp.lt.s32.totalorder %s509_s27, %s505_s19 }
  0x31   : > { %241 = vmatpush.bf16.msra.mxu0 %v225_v12  ;;  %401 = vmatpush.bf16.msra.mxu2 %v225_v12 }
  0x32   : > { %271 = vmatpush.bf16.msra.mxu1 %v262_v16  ;;  %403 = vmatpush.bf16.msra.mxu3 %v262_v16  ;;  %p507_p13 = pnand %p506_p6, %p634_p11  ;;  %p512_p5 = por %p511_p4, %p510_p3 }
  0x34   : > { %384 = vmatmul.msk.bf16.vlgmr.msra.gmra.mxu0 %vm227_vm0, %v195_v19  ;;  %385 = vmatmul.msk.bf16.vlgmr.msra.gmra.mxu2 %vm227_vm0, %v196_v20  ;;  %p508_p0 = pneg %p507_p13 }
  0x35   : > { %390 = vmatmul.msk.bf16.vlgmr.msra.gmra.mxu1 %vm227_vm0, %v195_v19  ;;  %391 = vmatmul.msk.bf16.vlgmr.msra.gmra.mxu3 %vm227_vm0, %v196_v20 }
  0x36   : > { %p513_p7 = pnand %p512_p5, %p508_p0 }
  0x37   : > { %218 = vperm.xlu1 %458, %v200_v21   ;;  %208 = vperm.xlu0 %457, %v198_v22  }
  0xa1   : > { %v204_v23 = vpop.permute.xlu0 %203  ;;  %v214_v28 = vpop.permute.xlu1 %213 }
  0xa9   : > { %v209_v32 = vpop.permute.xlu0 %208  ;;  %v219_v38 = vpop.permute.xlu1 %218 }
  0xb1   : > { %v243_v24 = vpop.f32.mrf.mxu0 }
  0xb2   : > { %v244_v25 = vadd.f32 %v243_v24, %v204_v23  ;;  %v273_v26 = vpop.f32.mrf.mxu1 }
  0xb3   : > { %v274_v27 = vadd.f32 %v273_v26, %v204_v23 }
  0xb4   : > { %253 = vst [vmem:[%s189_s5] sm:$0xff] %v244_v25 }
  0xb5   : > { %392 = vst [vmem:[%s189_s5 + $0x20] sm:$0xff] %v274_v27 }
  0xb7   : > { %v248_v29 = vpop.f32.mrf.mxu2 }
  0xb8   : > { %v249_v30 = vadd.f32 %v248_v29, %v214_v28  ;;  %v278_v31 = vpop.f32.mrf.mxu3 }
  0xb9   : > { %v279_v33 = vadd.f32 %v278_v31, %v214_v28  ;;  %v245_v34 = vpop.f32.mrf.mxu0 }
  0xba   : > { %255 = vst [vmem:[%s189_s5 + $0x10] sm:$0xff] %v249_v30  ;;  %v246_v35 = vadd.f32 %v245_v34, %v209_v32  ;;  %v275_v36 = vpop.f32.mrf.mxu1 }
  0xbb   : > { %394 = vst [vmem:[%s189_s5 + $0x30] sm:$0xff] %v279_v33  ;;  %v276_v37 = vadd.f32 %v275_v36, %v209_v32 }
  0xbc   : > { %254 = vst [vmem:[%s189_s5 + $0x8] sm:$0xff] %v246_v35 }
  0xbd   : > { %393 = vst [vmem:[%s189_s5 + $0x28] sm:$0xff] %v276_v37 }
  0xbf   : > { %v250_v39 = vpop.f32.mrf.mxu2 }
  0xc0   : > { %v251_v40 = vadd.f32 %v250_v39, %v219_v38  ;;  %v280_v41 = vpop.f32.mrf.mxu3 }
  0xc1   : > { %v281_v42 = vadd.f32 %v280_v41, %v219_v38 }
  0xc2   : > { %256 = vst [vmem:[%s189_s5 + $0x18] sm:$0xff] %v251_v40 }
  0xc3   : > { %395 = vst [vmem:[%s189_s5 + $0x38] sm:$0xff] %v281_v42 }
  0xc4   : > { %516 = shalt.err (!%p513_p7)
}
  0xc5   : > { %s561_s30 = smov 128   ;;  %s562_s29 = smov 256  }
  0xc6   : > { %s563_s6 = smov 8  }
  0xc7   : > { %406 = dma.vmem_to_hbm [thread:$0]  (%p634_p11), %s708_s4, 1024, %s303_s16, %s289_s11, %s561_s30, %s562_s29, %s563_s6  }
  0xc8 PF: > { %s317_s10 = sand.u32 1, %s543_s12   ;;  %p413_p8 = pnand %p378_p9, %p638_p12 }
  0xc9   : > { %s318_s5 = scalar_lea.sflag [#allocation4], %s317_s10 }
  0xca   : > { %p414_p10 = pneg %p413_p8 }
  0xcc   : > { %538 = dma.done.wait (%p414_p10), %s318_s5, 1024  }
  0xcd   : > { %540 = vsyncadd (%p414_p10), %s318_s5, 4294966272  ;;  %p16_p1 = scmp.ge.s32.totalorder %s609_s18, 4   ;;  %s749_s12 = smov %s547_s13 }
  0xce   : > { %s750_s13 = smov %s551_s14  ;;  %s751_s14 = smov %s621_s21 }
  0xcf   : > { %s752_s15 = smov %s609_s18  ;;  %18 = sbr.rel (!%p16_p1) target bundleno = 5 (0x5), region = 79 }
  0xd4   :  { %324 = vsyncpa [#allocation3], 1 }
  0xd5   :  { %326 = vsyncpa [#allocation3 + $0x1], 1 }
  0xd6   :  { %327 = vsyncpa [#allocation4], 1 }
  0xd7   :  { %329 = vsyncpa [#allocation4 + $0x1], 1 }

</bundles_post_ra>
